<compile_context>
chip_gen: v7x
topology: tpu7x:2x2x1
jax: 0.10.0
libtpu: 0.0.40
codegen_flags: <defaults>
</compile_context>

<pallas_src>
import functools

import jax
import jax.numpy as jnp
from jax.experimental import pallas as pl
from jax.experimental.pallas import tpu as pltpu


def _pool_out(n, k, s, p, dil):
    """Output extent of one max-pool layer (matches lax.reduce_window)."""
    return (n + 2 * p - dil * (k - 1) - 1) // s + 1


def _lane_shift(v, d):
    """out[..., j] = v[..., j + d] for 0 <= j + d < L, else -inf (logical halo)."""
    if d == 0:
        return v
    L = v.shape[-1]
    if abs(d) >= L:
        return jnp.full(v.shape, -jnp.inf, v.dtype)
    fill = jnp.full(v.shape[:-1] + (abs(d),), -jnp.inf, v.dtype)
    if d > 0:
        return jnp.concatenate([v[..., d:], fill], axis=-1)
    return jnp.concatenate([fill, v[..., : L + d]], axis=-1)


# ---------------------------------------------------------------------------
# Fused Pallas kernel: all SparseMaxPool3d layers for one batch item in VMEM.
# Layout inside the kernel: (D, H, W*C) with the W*C axis lane-dense.
# ---------------------------------------------------------------------------
def _fused_maxpool_kernel(x_ref, o_ref, *pad_refs, C, k, s, p, dil, layer_dims):
    num_layers = len(layer_dims)
    dtype = o_ref.dtype

    def ds(start, size):
        # Stride-folded window tap; used only on the D (outer) / H (sublane) axes.
        return pl.ds(start, size, stride=s) if s > 1 else pl.ds(start, size)

    # Map layers -> their padded-grid scratch (layer 0 needs none when p == 0).
    pads = []
    it = iter(pad_refs)
    for li in range(num_layers):
        pads.append(None if (li == 0 and p == 0) else next(it))

    for l, (din, hin, win, dout, hout, wout) in enumerate(layer_dims):
        dp, hp, Lin = din + 2 * p, hin + 2 * p, win * C
        pad_ref = pads[l]

        if pad_ref is None:
            src = x_ref                       # layer 0, p == 0: pool straight from the input block
        else:
            src = pad_ref
            if p > 0:
                # -inf halo slabs only (D and H).  The W halo is handled logically in
                # the lane-shift taps below, so the interior store stays lane-aligned.
                # Re-filled every grid step (tiny) rather than gated on program_id==0:
                # with dimension_semantics=("parallel",) the batch axis may be split
                # across TensorCores, so "first grid step" is not globally unique.
                pad_ref[0:p, :, :] = jnp.full((p, hp, Lin), -jnp.inf, dtype)
                pad_ref[p + din:dp, :, :] = jnp.full((p, hp, Lin), -jnp.inf, dtype)
                pad_ref[p:p + din, 0:p, :] = jnp.full((din, p, Lin), -jnp.inf, dtype)
                pad_ref[p:p + din, p + hin:hp, :] = jnp.full((din, p, Lin), -jnp.inf, dtype)
            if l == 0:
                # Interior <- densified input block (single pass; halo untouched).
                pad_ref[p:p + din, p:p + hin, :] = x_ref[...]
            # For l > 0 the interior was written by the previous layer's epilogue.

        # ---- H pass: k stride-folded loads from the (padded) ref, max on the VPU ----
        acc_h = src[:, ds(0, hout), :]
        for kh in range(1, k):
            acc_h = jnp.maximum(acc_h, src[:, ds(kh * dil, hout), :])
        # acc_h: (dp_or_din, hout, win*C), held in vregs.

        # ---- D pass: stride folded on the leading (untiled) axis, in vregs ----
        planes = []
        for od in range(dout):
            t = acc_h[od * s]
            for kd in range(1, k):
                t = jnp.maximum(t, acc_h[od * s + kd * dil])
            planes.append(t)
        acc = jnp.stack(planes, axis=0)       # (dout, hout, win*C)

        # ---- W pass: taps as lane shifts on the fused W*C axis (logical -inf halo) ----
        wspan = (wout - 1) * s + 1
        if wspan > win:                       # only when 2*p > dil*(k-1): keep subsample in range
            ext = jnp.full(acc.shape[:-1] + ((wspan - win) * C,), -jnp.inf, dtype)
            acc = jnp.concatenate([acc, ext], axis=-1)
        m = _lane_shift(acc, (0 - p) * C)
        for kw in range(1, k):
            m = jnp.maximum(m, _lane_shift(acc, (kw * dil - p) * C))

        # ---- output-stride subsample along the fused lane axis ----
        if s == 1:
            res = m[:, :, : wout * C]
        else:
            res = jnp.concatenate(
                [m[:, :, w * s * C: w * s * C + C] for w in range(wout)], axis=-1)
        # res: (dout, hout, wout*C)

        # ---- write straight into the next layer's pad interior / the final output ----
        if l == num_layers - 1:
            # SparseConvTensor.dense(): sites with no active inputs (still -inf) -> 0.
            o_ref[...] = jnp.where(res == -jnp.inf, jnp.zeros_like(res), res)
        else:
            nxt = pads[l + 1]
            nxt[p:p + dout, p:p + hout, :] = res


# ---------------------------------------------------------------------------
# Module forward: SparseConvTensor -> num_layers x SparseMaxPool3d -> dense()
# ---------------------------------------------------------------------------
def sparse_maxpool_forward(
    features, coors, batch_size, *, shape, num_layers, kernel_size, stride,
    padding, dilation
):
    D, H, W = shape
    C = features.shape[-1]
    dtype = features.dtype
    k, s, p, dil = kernel_size, stride, padding, dilation
    coors = coors.astype(jnp.int32)

    # Densify sparse features (channels-last); inactive voxels = -inf.  Duplicate
    # coordinates resolve via max (spconv assumes unique coords).
    # TODO(synk): fuse this scatter into the kernel via scalar-prefetched coors to
    # drop a full dense HBM write+read at real spconv grid sizes.
    dense = jnp.full((batch_size, D, H, W, C), -jnp.inf, dtype)
    dense = dense.at[coors[:, 0], coors[:, 1], coors[:, 2], coors[:, 3]].max(features)
    # Lane-dense repack: fuse (W, C) into the minor axis (W*C = 128 at layer 0 here).
    # Row-major reshape of a contiguous array = free layout plumbing.
    dense = dense.reshape(batch_size, D, H, W * C)

    # Static per-layer geometry.
    layer_dims = []
    d, h, w = D, H, W
    for _ in range(num_layers):
        od, oh, ow = (_pool_out(n, k, s, p, dil) for n in (d, h, w))
        layer_dims.append((d, h, w, od, oh, ow))
        d, h, w = od, oh, ow
    Df, Hf, Wf = layer_dims[-1][3:]

    # One padded-grid scratch per layer (D/H halo only; W halo is logical).  No
    # tmpd/tmph buffers; later layers shrink ~stride^3, so peak VMEM ~= layer 0.
    scratch_shapes = []
    for l, (din, hin, win, _, _, _) in enumerate(layer_dims):
        if l == 0 and p == 0:
            continue                          # layer 0 pools straight out of the input block
        scratch_shapes.append(
            pltpu.VMEM((din + 2 * p, hin + 2 * p, win * C), dtype))

    kern = functools.partial(
        _fused_maxpool_kernel, C=C, k=k, s=s, p=p, dil=dil,
        layer_dims=tuple(layer_dims),
    )

    out = pl.pallas_call(
        kern,
        out_shape=jax.ShapeDtypeStruct((batch_size, Df, Hf, Wf * C), dtype),
        grid_spec=pltpu.PrefetchScalarGridSpec(
            num_scalar_prefetch=0,
            grid=(batch_size,),
            in_specs=[
                pl.BlockSpec((pl.Squeezed(), D, H, W * C), lambda b: (b, 0, 0, 0))
            ],
            out_specs=pl.BlockSpec(
                (pl.Squeezed(), Df, Hf, Wf * C), lambda b: (b, 0, 0, 0)
            ),
            scratch_shapes=scratch_shapes,
        ),
        compiler_params=pltpu.CompilerParams(
            dimension_semantics=("parallel",),
            # Budget against v7x (64 MiB physical / 32 MiB default scoped VMEM); the
            # whole per-batch working set of this config is well under 1 MiB.
            vmem_limit_bytes=32 * 1024 * 1024,
        ),
    )(dense)

    # Un-fuse the lane axis and go to NCDHW for PyTorch parity (layout plumbing only).
    out = out.reshape(batch_size, Df, Hf, Wf, C)
    return jnp.transpose(out, (0, 4, 1, 2, 3))


# ---------------------------------------------------------------------------
# Pure-JAX reference (lax.reduce_window) for correctness checking.
# ---------------------------------------------------------------------------
def sparse_maxpool_reference(
    features, coors, batch_size, *, shape, num_layers, kernel_size, stride,
    padding, dilation
):
    D, H, W = shape
    C = features.shape[-1]
    coors = coors.astype(jnp.int32)
    dense = jnp.full((batch_size, D, H, W, C), -jnp.inf, features.dtype)
    dense = dense.at[coors[:, 0], coors[:, 1], coors[:, 2], coors[:, 3]].max(features)

    k, s, p, dil = kernel_size, stride, padding, dilation
    x = dense
    for _ in range(num_layers):
        x = jax.lax.reduce_window(
            x,
            -jnp.inf,
            jax.lax.max,
            window_dimensions=(1, k, k, k, 1),
            window_strides=(1, s, s, s, 1),
            padding=((0, 0), (p, p), (p, p), (p, p), (0, 0)),
            base_dilation=(1, 1, 1, 1, 1),
            window_dilation=(1, dil, dil, dil, 1),
        )
    x = jnp.where(x == -jnp.inf, jnp.zeros_like(x), x)
    return jnp.transpose(x, (0, 4, 1, 2, 3))


if __name__ == "__main__":
    # Small, deterministic sparse input.
    num_layers = 2
    kernel_size, stride, padding, dilation = 3, 2, 1, 1
    shape = (8, 8, 8)          # (D, H, W)
    batch_size = 2
    C = 16
    pts_per_batch = 20
    D, H, W = shape

    key = jax.random.PRNGKey(0)
    kf, kc = jax.random.split(key)

    # Unique voxel coordinates per batch item (spconv assumes unique coords).
    coors_list = []
    for b in range(batch_size):
        kc, sub = jax.random.split(kc)
        lin = jax.random.permutation(sub, D * H * W)[:pts_per_batch]
        zz = lin // (H * W)
        yy = (lin // W) % H
        xx = lin % W
        bb = jnp.full_like(zz, b)
        coors_list.append(jnp.stack([bb, zz, yy, xx], axis=1))
    coors = jnp.concatenate(coors_list, axis=0).astype(jnp.int32)        # [N, 4]
    features = jax.random.normal(kf, (coors.shape[0], C), jnp.float32)   # [N, C]

    out = sparse_maxpool_forward(
        features, coors, batch_size,
        shape=shape, num_layers=num_layers, kernel_size=kernel_size,
        stride=stride, padding=padding, dilation=dilation,
    )
    out = jax.block_until_ready(out)

    ref = sparse_maxpool_reference(
        features, coors, batch_size,
        shape=shape, num_layers=num_layers, kernel_size=kernel_size,
        stride=stride, padding=padding, dilation=dilation,
    )

    assert out.shape == ref.shape, (out.shape, ref.shape)
    assert jnp.allclose(out, ref, atol=1e-6), "Pallas max-pool mismatch vs reference"
    print("KERNEL_OK")
</pallas_src>

<mosaic_0001>
module attributes {stable_mosaic.version = 11 : i64} {
  func.func @_fused_maxpool_kernel(%arg0: i32, %arg1: memref<1x8x8x128xf32, #tpu.memory_space<vmem>>, %arg2: memref<1x2x2x32xf32, #tpu.memory_space<vmem>>, %arg3: memref<10x10x128xf32, #tpu.memory_space<vmem>>, %arg4: memref<6x6x64xf32, #tpu.memory_space<vmem>>) attributes {dimension_semantics = [#tpu.dimension_semantics<parallel>], iteration_bounds = array<i64: 2>, scalar_prefetch = 0 : i64, scratch_operands = 2 : i64, tpu.core_type = #tpu.core_type<tc>, window_params = [{transform_indices = @transform_0, window_bounds = array<i64: 1, 8, 8, 128>}, {transform_indices = @transform_1, window_bounds = array<i64: 1, 2, 2, 32>}]} {
    %cst = arith.constant 0xFF800000 : f32
    %0 = vector.broadcast %cst : f32 to vector<1x10x128xf32>
    %c0 = arith.constant 0 : index
    %c0_0 = arith.constant 0 : index
    %c0_1 = arith.constant 0 : index
    %1 = vector.load %arg3[%c0, %c0_0, %c0_1] : memref<10x10x128xf32, #tpu.memory_space<vmem>>, vector<1x10x128xf32>
    tpu.vector_store %arg3[%c0, %c0_0, %c0_1], %0 {strides = array<i32>} : memref<10x10x128xf32, #tpu.memory_space<vmem>>, vector<1x10x128xf32>,
    %cst_2 = arith.constant 0xFF800000 : f32
    %2 = vector.broadcast %cst_2 : f32 to vector<1x10x128xf32>
    %c9 = arith.constant 9 : index
    %c0_3 = arith.constant 0 : index
    %c0_4 = arith.constant 0 : index
    %3 = vector.load %arg3[%c9, %c0_3, %c0_4] : memref<10x10x128xf32, #tpu.memory_space<vmem>>, vector<1x10x128xf32>
    tpu.vector_store %arg3[%c9, %c0_3, %c0_4], %2 {strides = array<i32>} : memref<10x10x128xf32, #tpu.memory_space<vmem>>, vector<1x10x128xf32>,
    %cst_5 = arith.constant 0xFF800000 : f32
    %4 = vector.broadcast %cst_5 : f32 to vector<8x1x128xf32>
    %c1 = arith.constant 1 : index
    %c0_6 = arith.constant 0 : index
    %c0_7 = arith.constant 0 : index
    %5 = vector.load %arg3[%c1, %c0_6, %c0_7] : memref<10x10x128xf32, #tpu.memory_space<vmem>>, vector<8x1x128xf32>
    tpu.vector_store %arg3[%c1, %c0_6, %c0_7], %4 {strides = array<i32>} : memref<10x10x128xf32, #tpu.memory_space<vmem>>, vector<8x1x128xf32>,
    %cst_8 = arith.constant 0xFF800000 : f32
    %6 = vector.broadcast %cst_8 : f32 to vector<8x1x128xf32>
    %c1_9 = arith.constant 1 : index
    %c9_10 = arith.constant 9 : index
    %c0_11 = arith.constant 0 : index
    %7 = vector.load %arg3[%c1_9, %c9_10, %c0_11] : memref<10x10x128xf32, #tpu.memory_space<vmem>>, vector<8x1x128xf32>
    tpu.vector_store %arg3[%c1_9, %c9_10, %c0_11], %6 {strides = array<i32>} : memref<10x10x128xf32, #tpu.memory_space<vmem>>, vector<8x1x128xf32>,
    %c0_12 = arith.constant 0 : index
    %c0_13 = arith.constant 0 : index
    %c0_14 = arith.constant 0 : index
    %c0_15 = arith.constant 0 : index
    %8 = vector.load %arg1[%c0_12, %c0_13, %c0_14, %c0_15] : memref<1x8x8x128xf32, #tpu.memory_space<vmem>>, vector<1x8x8x128xf32>
    %9 = vector.shape_cast %8 : vector<1x8x8x128xf32> to vector<8x8x128xf32>
    %c1_16 = arith.constant 1 : index
    %c1_17 = arith.constant 1 : index
    %c0_18 = arith.constant 0 : index
    %10 = vector.load %arg3[%c1_16, %c1_17, %c0_18] : memref<10x10x128xf32, #tpu.memory_space<vmem>>, vector<8x8x128xf32>
    tpu.vector_store %arg3[%c1_16, %c1_17, %c0_18], %9 {strides = array<i32>} : memref<10x10x128xf32, #tpu.memory_space<vmem>>, vector<8x8x128xf32>,
    %c0_19 = arith.constant 0 : index
    %c0_20 = arith.constant 0 : index
    %c0_21 = arith.constant 0 : index
    %11 = tpu.strided_load %arg3[%c0_19, %c0_20, %c0_21] {strides = array<i32: 1, 2, 1>} : memref<10x10x128xf32, #tpu.memory_space<vmem>>, vector<10x4x128xf32>
    %c0_22 = arith.constant 0 : index
    %c1_23 = arith.constant 1 : index
    %c0_24 = arith.constant 0 : index
    %12 = tpu.strided_load %arg3[%c0_22, %c1_23, %c0_24] {strides = array<i32: 1, 2, 1>} : memref<10x10x128xf32, #tpu.memory_space<vmem>>, vector<10x4x128xf32>
    %13 = arith.maximumf %11, %12 : vector<10x4x128xf32>
    %c0_25 = arith.constant 0 : index
    %c2 = arith.constant 2 : index
    %c0_26 = arith.constant 0 : index
    %14 = tpu.strided_load %arg3[%c0_25, %c2, %c0_26] {strides = array<i32: 1, 2, 1>} : memref<10x10x128xf32, #tpu.memory_space<vmem>>, vector<10x4x128xf32>
    %15 = arith.maximumf %13, %14 : vector<10x4x128xf32>
    %16 = vector.extract_strided_slice %15 {offsets = [0, 0, 0], sizes = [1, 4, 128], strides = [1, 1, 1]} : vector<10x4x128xf32> to vector<1x4x128xf32>
    %17 = vector.shape_cast %16 : vector<1x4x128xf32> to vector<4x128xf32>
    %18 = vector.extract_strided_slice %15 {offsets = [1, 0, 0], sizes = [1, 4, 128], strides = [1, 1, 1]} : vector<10x4x128xf32> to vector<1x4x128xf32>
    %19 = vector.shape_cast %18 : vector<1x4x128xf32> to vector<4x128xf32>
    %20 = arith.maximumf %17, %19 : vector<4x128xf32>
    %21 = vector.extract_strided_slice %15 {offsets = [2, 0, 0], sizes = [1, 4, 128], strides = [1, 1, 1]} : vector<10x4x128xf32> to vector<1x4x128xf32>
    %22 = vector.shape_cast %21 : vector<1x4x128xf32> to vector<4x128xf32>
    %23 = arith.maximumf %20, %22 : vector<4x128xf32>
    %24 = vector.extract_strided_slice %15 {offsets = [2, 0, 0], sizes = [1, 4, 128], strides = [1, 1, 1]} : vector<10x4x128xf32> to vector<1x4x128xf32>
    %25 = vector.shape_cast %24 : vector<1x4x128xf32> to vector<4x128xf32>
    %26 = vector.extract_strided_slice %15 {offsets = [3, 0, 0], sizes = [1, 4, 128], strides = [1, 1, 1]} : vector<10x4x128xf32> to vector<1x4x128xf32>
    %27 = vector.shape_cast %26 : vector<1x4x128xf32> to vector<4x128xf32>
    %28 = arith.maximumf %25, %27 : vector<4x128xf32>
    %29 = vector.extract_strided_slice %15 {offsets = [4, 0, 0], sizes = [1, 4, 128], strides = [1, 1, 1]} : vector<10x4x128xf32> to vector<1x4x128xf32>
    %30 = vector.shape_cast %29 : vector<1x4x128xf32> to vector<4x128xf32>
    %31 = arith.maximumf %28, %30 : vector<4x128xf32>
    %32 = vector.extract_strided_slice %15 {offsets = [4, 0, 0], sizes = [1, 4, 128], strides = [1, 1, 1]} : vector<10x4x128xf32> to vector<1x4x128xf32>
    %33 = vector.shape_cast %32 : vector<1x4x128xf32> to vector<4x128xf32>
    %34 = vector.extract_strided_slice %15 {offsets = [5, 0, 0], sizes = [1, 4, 128], strides = [1, 1, 1]} : vector<10x4x128xf32> to vector<1x4x128xf32>
    %35 = vector.shape_cast %34 : vector<1x4x128xf32> to vector<4x128xf32>
    %36 = arith.maximumf %33, %35 : vector<4x128xf32>
    %37 = vector.extract_strided_slice %15 {offsets = [6, 0, 0], sizes = [1, 4, 128], strides = [1, 1, 1]} : vector<10x4x128xf32> to vector<1x4x128xf32>
    %38 = vector.shape_cast %37 : vector<1x4x128xf32> to vector<4x128xf32>
    %39 = arith.maximumf %36, %38 : vector<4x128xf32>
    %40 = vector.extract_strided_slice %15 {offsets = [6, 0, 0], sizes = [1, 4, 128], strides = [1, 1, 1]} : vector<10x4x128xf32> to vector<1x4x128xf32>
    %41 = vector.shape_cast %40 : vector<1x4x128xf32> to vector<4x128xf32>
    %42 = vector.extract_strided_slice %15 {offsets = [7, 0, 0], sizes = [1, 4, 128], strides = [1, 1, 1]} : vector<10x4x128xf32> to vector<1x4x128xf32>
    %43 = vector.shape_cast %42 : vector<1x4x128xf32> to vector<4x128xf32>
    %44 = arith.maximumf %41, %43 : vector<4x128xf32>
    %45 = vector.extract_strided_slice %15 {offsets = [8, 0, 0], sizes = [1, 4, 128], strides = [1, 1, 1]} : vector<10x4x128xf32> to vector<1x4x128xf32>
    %46 = vector.shape_cast %45 : vector<1x4x128xf32> to vector<4x128xf32>
    %47 = arith.maximumf %44, %46 : vector<4x128xf32>
    %48 = vector.shape_cast %23 : vector<4x128xf32> to vector<1x4x128xf32>
    %49 = vector.shape_cast %31 : vector<4x128xf32> to vector<1x4x128xf32>
    %50 = vector.shape_cast %39 : vector<4x128xf32> to vector<1x4x128xf32>
    %51 = vector.shape_cast %47 : vector<4x128xf32> to vector<1x4x128xf32>
    %52 = tpu.concatenate %48, %49, %50, %51 in 0 : vector<1x4x128xf32>, vector<1x4x128xf32>, vector<1x4x128xf32>, vector<1x4x128xf32> -> vector<4x4x128xf32>
    %cst_27 = arith.constant 0xFF800000 : f32
    %53 = vector.broadcast %cst_27 : f32 to vector<4x4x16xf32>
    %54 = vector.extract_strided_slice %52 {offsets = [0, 0, 0], sizes = [4, 4, 112], strides = [1, 1, 1]} : vector<4x4x128xf32> to vector<4x4x112xf32>
    %55 = tpu.concatenate %53, %54 in 2 : vector<4x4x16xf32>, vector<4x4x112xf32> -> vector<4x4x128xf32>
    %56 = arith.maximumf %55, %52 : vector<4x4x128xf32>
    %cst_28 = arith.constant 0xFF800000 : f32
    %57 = vector.broadcast %cst_28 : f32 to vector<4x4x16xf32>
    %58 = vector.extract_strided_slice %52 {offsets = [0, 0, 16], sizes = [4, 4, 112], strides = [1, 1, 1]} : vector<4x4x128xf32> to vector<4x4x112xf32>
    %59 = tpu.concatenate %58, %57 in 2 : vector<4x4x112xf32>, vector<4x4x16xf32> -> vector<4x4x128xf32>
    %60 = arith.maximumf %56, %59 : vector<4x4x128xf32>
    %61 = vector.extract_strided_slice %60 {offsets = [0, 0, 0], sizes = [4, 4, 16], strides = [1, 1, 1]} : vector<4x4x128xf32> to vector<4x4x16xf32>
    %62 = vector.extract_strided_slice %60 {offsets = [0, 0, 32], sizes = [4, 4, 16], strides = [1, 1, 1]} : vector<4x4x128xf32> to vector<4x4x16xf32>
    %63 = vector.extract_strided_slice %60 {offsets = [0, 0, 64], sizes = [4, 4, 16], strides = [1, 1, 1]} : vector<4x4x128xf32> to vector<4x4x16xf32>
    %64 = vector.extract_strided_slice %60 {offsets = [0, 0, 96], sizes = [4, 4, 16], strides = [1, 1, 1]} : vector<4x4x128xf32> to vector<4x4x16xf32>
    %65 = tpu.concatenate %61, %62, %63, %64 in 2 : vector<4x4x16xf32>, vector<4x4x16xf32>, vector<4x4x16xf32>, vector<4x4x16xf32> -> vector<4x4x64xf32>
    %c1_29 = arith.constant 1 : index
    %c1_30 = arith.constant 1 : index
    %c0_31 = arith.constant 0 : index
    %66 = vector.load %arg4[%c1_29, %c1_30, %c0_31] : memref<6x6x64xf32, #tpu.memory_space<vmem>>, vector<4x4x64xf32>
    tpu.vector_store %arg4[%c1_29, %c1_30, %c0_31], %65 {strides = array<i32>} : memref<6x6x64xf32, #tpu.memory_space<vmem>>, vector<4x4x64xf32>,
    %cst_32 = arith.constant 0xFF800000 : f32
    %67 = vector.broadcast %cst_32 : f32 to vector<1x6x64xf32>
    %c0_33 = arith.constant 0 : index
    %c0_34 = arith.constant 0 : index
    %c0_35 = arith.constant 0 : index
    %68 = vector.load %arg4[%c0_33, %c0_34, %c0_35] : memref<6x6x64xf32, #tpu.memory_space<vmem>>, vector<1x6x64xf32>
    tpu.vector_store %arg4[%c0_33, %c0_34, %c0_35], %67 {strides = array<i32>} : memref<6x6x64xf32, #tpu.memory_space<vmem>>, vector<1x6x64xf32>,
    %cst_36 = arith.constant 0xFF800000 : f32
    %69 = vector.broadcast %cst_36 : f32 to vector<1x6x64xf32>
    %c5 = arith.constant 5 : index
    %c0_37 = arith.constant 0 : index
    %c0_38 = arith.constant 0 : index
    %70 = vector.load %arg4[%c5, %c0_37, %c0_38] : memref<6x6x64xf32, #tpu.memory_space<vmem>>, vector<1x6x64xf32>
    tpu.vector_store %arg4[%c5, %c0_37, %c0_38], %69 {strides = array<i32>} : memref<6x6x64xf32, #tpu.memory_space<vmem>>, vector<1x6x64xf32>,
    %cst_39 = arith.constant 0xFF800000 : f32
    %71 = vector.broadcast %cst_39 : f32 to vector<4x1x64xf32>
    %c1_40 = arith.constant 1 : index
    %c0_41 = arith.constant 0 : index
    %c0_42 = arith.constant 0 : index
    %72 = vector.load %arg4[%c1_40, %c0_41, %c0_42] : memref<6x6x64xf32, #tpu.memory_space<vmem>>, vector<4x1x64xf32>
    tpu.vector_store %arg4[%c1_40, %c0_41, %c0_42], %71 {strides = array<i32>} : memref<6x6x64xf32, #tpu.memory_space<vmem>>, vector<4x1x64xf32>,
    %cst_43 = arith.constant 0xFF800000 : f32
    %73 = vector.broadcast %cst_43 : f32 to vector<4x1x64xf32>
    %c1_44 = arith.constant 1 : index
    %c5_45 = arith.constant 5 : index
    %c0_46 = arith.constant 0 : index
    %74 = vector.load %arg4[%c1_44, %c5_45, %c0_46] : memref<6x6x64xf32, #tpu.memory_space<vmem>>, vector<4x1x64xf32>
    tpu.vector_store %arg4[%c1_44, %c5_45, %c0_46], %73 {strides = array<i32>} : memref<6x6x64xf32, #tpu.memory_space<vmem>>, vector<4x1x64xf32>,
    %c0_47 = arith.constant 0 : index
    %c0_48 = arith.constant 0 : index
    %c0_49 = arith.constant 0 : index
    %75 = tpu.strided_load %arg4[%c0_47, %c0_48, %c0_49] {strides = array<i32: 1, 2, 1>} : memref<6x6x64xf32, #tpu.memory_space<vmem>>, vector<6x2x64xf32>
    %c0_50 = arith.constant 0 : index
    %c1_51 = arith.constant 1 : index
    %c0_52 = arith.constant 0 : index
    %76 = tpu.strided_load %arg4[%c0_50, %c1_51, %c0_52] {strides = array<i32: 1, 2, 1>} : memref<6x6x64xf32, #tpu.memory_space<vmem>>, vector<6x2x64xf32>
    %77 = arith.maximumf %75, %76 : vector<6x2x64xf32>
    %c0_53 = arith.constant 0 : index
    %c2_54 = arith.constant 2 : index
    %c0_55 = arith.constant 0 : index
    %78 = tpu.strided_load %arg4[%c0_53, %c2_54, %c0_55] {strides = array<i32: 1, 2, 1>} : memref<6x6x64xf32, #tpu.memory_space<vmem>>, vector<6x2x64xf32>
    %79 = arith.maximumf %77, %78 : vector<6x2x64xf32>
    %80 = vector.extract_strided_slice %79 {offsets = [0, 0, 0], sizes = [1, 2, 64], strides = [1, 1, 1]} : vector<6x2x64xf32> to vector<1x2x64xf32>
    %81 = vector.shape_cast %80 : vector<1x2x64xf32> to vector<2x64xf32>
    %82 = vector.extract_strided_slice %79 {offsets = [1, 0, 0], sizes = [1, 2, 64], strides = [1, 1, 1]} : vector<6x2x64xf32> to vector<1x2x64xf32>
    %83 = vector.shape_cast %82 : vector<1x2x64xf32> to vector<2x64xf32>
    %84 = arith.maximumf %81, %83 : vector<2x64xf32>
    %85 = vector.extract_strided_slice %79 {offsets = [2, 0, 0], sizes = [1, 2, 64], strides = [1, 1, 1]} : vector<6x2x64xf32> to vector<1x2x64xf32>
    %86 = vector.shape_cast %85 : vector<1x2x64xf32> to vector<2x64xf32>
    %87 = arith.maximumf %84, %86 : vector<2x64xf32>
    %88 = vector.extract_strided_slice %79 {offsets = [2, 0, 0], sizes = [1, 2, 64], strides = [1, 1, 1]} : vector<6x2x64xf32> to vector<1x2x64xf32>
    %89 = vector.shape_cast %88 : vector<1x2x64xf32> to vector<2x64xf32>
    %90 = vector.extract_strided_slice %79 {offsets = [3, 0, 0], sizes = [1, 2, 64], strides = [1, 1, 1]} : vector<6x2x64xf32> to vector<1x2x64xf32>
    %91 = vector.shape_cast %90 : vector<1x2x64xf32> to vector<2x64xf32>
    %92 = arith.maximumf %89, %91 : vector<2x64xf32>
    %93 = vector.extract_strided_slice %79 {offsets = [4, 0, 0], sizes = [1, 2, 64], strides = [1, 1, 1]} : vector<6x2x64xf32> to vector<1x2x64xf32>
    %94 = vector.shape_cast %93 : vector<1x2x64xf32> to vector<2x64xf32>
    %95 = arith.maximumf %92, %94 : vector<2x64xf32>
    %96 = vector.shape_cast %87 : vector<2x64xf32> to vector<1x2x64xf32>
    %97 = vector.shape_cast %95 : vector<2x64xf32> to vector<1x2x64xf32>
    %98 = tpu.concatenate %96, %97 in 0 : vector<1x2x64xf32>, vector<1x2x64xf32> -> vector<2x2x64xf32>
    %cst_56 = arith.constant 0xFF800000 : f32
    %99 = vector.broadcast %cst_56 : f32 to vector<2x2x16xf32>
    %100 = vector.extract_strided_slice %98 {offsets = [0, 0, 0], sizes = [2, 2, 48], strides = [1, 1, 1]} : vector<2x2x64xf32> to vector<2x2x48xf32>
    %101 = tpu.concatenate %99, %100 in 2 : vector<2x2x16xf32>, vector<2x2x48xf32> -> vector<2x2x64xf32>
    %102 = arith.maximumf %101, %98 : vector<2x2x64xf32>
    %cst_57 = arith.constant 0xFF800000 : f32
    %103 = vector.broadcast %cst_57 : f32 to vector<2x2x16xf32>
    %104 = vector.extract_strided_slice %98 {offsets = [0, 0, 16], sizes = [2, 2, 48], strides = [1, 1, 1]} : vector<2x2x64xf32> to vector<2x2x48xf32>
    %105 = tpu.concatenate %104, %103 in 2 : vector<2x2x48xf32>, vector<2x2x16xf32> -> vector<2x2x64xf32>
    %106 = arith.maximumf %102, %105 : vector<2x2x64xf32>
    %107 = vector.extract_strided_slice %106 {offsets = [0, 0, 0], sizes = [2, 2, 16], strides = [1, 1, 1]} : vector<2x2x64xf32> to vector<2x2x16xf32>
    %108 = vector.extract_strided_slice %106 {offsets = [0, 0, 32], sizes = [2, 2, 16], strides = [1, 1, 1]} : vector<2x2x64xf32> to vector<2x2x16xf32>
    %109 = tpu.concatenate %107, %108 in 2 : vector<2x2x16xf32>, vector<2x2x16xf32> -> vector<2x2x32xf32>
    %cst_58 = arith.constant 0xFF800000 : f32
    %110 = vector.broadcast %cst_58 : f32 to vector<2x2x32xf32>
    %111 = arith.cmpf oeq, %109, %110 : vector<2x2x32xf32>
    %cst_59 = arith.constant 0.000000e+00 : f32
    %112 = vector.broadcast %cst_59 : f32 to vector<2x2x32xf32>
    %113 = arith.select %111, %112, %109 : vector<2x2x32xi1>, vector<2x2x32xf32>
    %c0_60 = arith.constant 0 : index
    %c0_61 = arith.constant 0 : index
    %c0_62 = arith.constant 0 : index
    %c0_63 = arith.constant 0 : index
    %114 = vector.load %arg2[%c0_60, %c0_61, %c0_62, %c0_63] : memref<1x2x2x32xf32, #tpu.memory_space<vmem>>, vector<1x2x2x32xf32>
    %115 = vector.shape_cast %114 : vector<1x2x2x32xf32> to vector<2x2x32xf32>
    %116 = vector.shape_cast %113 : vector<2x2x32xf32> to vector<1x2x2x32xf32>
    tpu.vector_store %arg2[%c0_60, %c0_61, %c0_62, %c0_63], %116 {strides = array<i32>} : memref<1x2x2x32xf32, #tpu.memory_space<vmem>>, vector<1x2x2x32xf32>,
    return
  }
  func.func @transform_0(%arg0: i32) -> (i32, i32, i32, i32) {
    %c0_i32 = arith.constant 0 : i32
    %c0_i32_0 = arith.constant 0 : i32
    %c0_i32_1 = arith.constant 0 : i32
    %c0_i32_2 = arith.constant 0 : i32
    return %arg0, %c0_i32, %c0_i32_0, %c0_i32_1 : i32, i32, i32, i32
  }
  func.func @transform_1(%arg0: i32) -> (i32, i32, i32, i32) {
    %c0_i32 = arith.constant 0 : i32
    %c0_i32_0 = arith.constant 0 : i32
    %c0_i32_1 = arith.constant 0 : i32
    %c0_i32_2 = arith.constant 0 : i32
    return %arg0, %c0_i32, %c0_i32_0, %c0_i32_1 : i32, i32, i32, i32
  }
}

</mosaic_0001>

<bundles_post_ra>
// kernel: tpu_custom_call.1
= control target key start
LH: loop header
LB: loop body
LE: loop exit
PB: predicated region body
PF: predicated region fallthrough
CT: control target
= control target key end

     0   :  { %6 = vsyncpa [#allocation5], 0  ;;  %s956_s0 = inlined_call_operand.hbm [shape: f32[2,8,8,128], index: 0, kind: input, shape index: {}]   ;;  %s957_s1 = inlined_call_operand.hbm [shape: f32[2,2,2,32], index: 1, kind: output, shape index: {}]  }
   0x1   :  { %8 = vsyncpa [#allocation5 + $0x1], 0 }
   0x2   :  { %9 = vsyncpa [#allocation6], 0 }
   0x3   :  { %11 = vsyncpa [#allocation6 + $0x1], 0  ;;  %s730_s6 = smov 0   ;;  %s732_s7 = smov 0  }
   0x4   :  { %s734_s8 = smov 0   ;;  %s736_s9 = smov 0  }
   0x5 LB: > { %s751_s10 = sadd.s32 4294967295, %s707_s9   ;;  %s540_s11 = sadd.s32 4294967294, %s707_s9   ;;  %s707_s9 = sphi %s736_s9, %s970_s9   ;;  %s703_s8 = sphi %s734_s8, %s969_s8   ;;  %s699_s7 = sphi %s732_s7, %s968_s7   ;;  %s695_s6 = sphi %s730_s6, %s967_s6  }
   0x6   : > { %s755_s12 = sadd.s32 1, %s707_s9   ;;  %s24_s13 = sadd.s32 1, %s703_s8 }
   0x7   : > { %s21_s14 = ssub.s32 %s707_s9, %s755_s12  ;;  %p31_p0 = scmp.ne.s32.totalorder %s703_s8, %s699_s7 }
   0x8   : > { %p22_p1 = scmp.eq.s32.totalorder %s21_s14, 0  ;;  %p32_p2 = scmp.eq.s32.totalorder %s707_s9, 0 }
   0x9   : > { %p37_p3 = scmp.ne.s32.totalorder %s699_s7, %s695_s6  ;;  %p38_p4 = scmp.eq.s32.totalorder %s751_s10, 0 }
   0xa   : > { %s767_s15 = scalar_select %p22_p1, %s703_s8, %s24_s13  }
   0xb   : > { %p769_p5 = por %p32_p2, %p31_p0  ;;  %p773_p6 = por %p38_p4, %p37_p3 }
   0xc   : > { %p61_p7 = scmp.eq.s32.totalorder %s751_s10, 1  ;;  %p67_p8 = scmp.eq.s32.totalorder %s540_s11, 1 }
   0xd   : > { %p568_p10 = scmp.lt.s32.totalorder %s707_s9, 2  ;;  %s87_s20 = sand.u32 1, %s703_s8  }
   0xe   : > { %p780_p11 = por %p61_p7, %p31_p0  ;;  %p784_p12 = por %p67_p8, %p37_p3 }
   0xf   : > { %s554_s21 = sshll.u32 %s707_s9, 10  ;;  %s543_s22 = sshll.u32 %s87_s20, 6 }
  0x10   : > { %s961_s18 = scalar_select %p780_p11, 1, 0 }
  0x11   : > { %s962_s19 = scalar_select %p784_p12, 1, 0 }
  0x12   : > { %s793_s25 = scalar_lea.hbm %s956_s0, %s554_s21  ;;  %s91_s26 = scalar_lea.vmem [#allocation4], %s543_s22 }
  0x13   : > { %s98_s27 = sshll.u32 %s91_s26, 4  ;;  %p797_p13 = pnand %p568_p10, %p769_p5  ;;  %s801_s27 = int_to_ptr.vmem [resolvable:$true] %s98_s27 }
  0x14   : > { %s803_s29 = scalar_lea.sflag [#allocation5], %s87_s20  ;;  %s611_s30 = scalar_lea.hbm %s793_s25, 1024 }
  0x15   : > { %p612_p0 = scmp.ne.s32.totalorder %s793_s25, %s611_s30  ;;  %p613_p1 = pneg %p797_p13 }
  0x16   : > { %s616_s4 = scalar_lea.hbm %s956_s0, 2048  ;;  %p617_p4 = scmp.lt.u32.totalorder %s793_s25, %s956_s0 }
  0x17   : > { %p614_p2 = pnand %p613_p1, %p612_p0  ;;  %p618_p5 = scmp.lt.u32.totalorder %s616_s4, %s611_s30 }
  0x18   : > { %p620_p8 = scmp.lt.u32.totalorder %s611_s30, %s793_s25 }
  0x19   : > { %p615_p3 = pneg %p614_p2  ;;  %p619_p7 = por %p618_p5, %p617_p4 }
  0x1b   : > { %p621_p10 = por %p620_p8, %p619_p7 }
  0x1d   : > { %p622_p9 = pnand %p621_p10, %p615_p3 }
  0x1f   : > { %625 = shalt.err (!%p622_p9)
}
  0x20   : > { %s626_s13 = scalar_lea.vmem %s801_s27, 1024  ;;  %s709_s14 = smov [#allocation4]  }
  0x21   : > { %p627_p0 = scmp.ne.s32.totalorder %s801_s27, %s626_s13  ;;  %s631_s16 = sshll.u32 %s709_s14, 4  ;;  %s632_s16 = int_to_ptr.vmem [resolvable:$false] %s631_s16 }
  0x22   : > { %s633_s20 = scalar_lea.vmem %s632_s16, 2048  ;;  %p634_p11 = scmp.lt.s32.totalorder %s801_s27, %s632_s16 }
  0x23   : > { %p629_p2 = pnand %p627_p0, %p613_p1  ;;  %p635_p4 = scmp.lt.s32.totalorder %s633_s20, %s626_s13 }
  0x25   : > { %p630_p12 = pneg %p629_p2  ;;  %p636_p5 = por %p635_p4, %p634_p11 }
  0x27   : > { %p637_p7 = pnand %p636_p5, %p630_p12 }
  0x29   : > { %640 = shalt.err (!%p637_p7)
}
  0x2a   : > { %s710_s21 = smov 128   ;;  %s711_s22 = smov 8  }
  0x2b   : > { %563 = dma.hbm_to_vmem [thread:$0]  (!%p797_p13), %s793_s25, 1024, %s801_s27, %s803_s29, %s710_s21, %s710_s21, %s711_s22  }
  0x2c   : > { %p546_p9 = scmp.ge.s32.totalorder %s707_s9, 1  ;;  %p106_p1 = scmp.lt.s32.totalorder %s707_s9, 3 }
  0x2e   : > { %p107_p3 = pnand %p546_p9, %p106_p1 }
  0x2f   : > { %s834_s23 = sand.u32 (!%p107_p3), 1, %s699_s7  }
  0x30   : > { %110 = sbr.rel (%p107_p3) target bundleno = 617 (0x269), region = 24  ;;  %s547_s24 = sshll.u32 (!%p107_p3), %s834_s23, 6 }
  0x31   : > { %s113_s26 = scalar_lea.sflag (!%p107_p3), [#allocation5], %s834_s23  ;;  %s116_s30 = scalar_lea.vmem (!%p107_p3), [#allocation4], %s547_s24 }
  0x37   : > { %686 = dma.done.wait (%p773_p6), %s113_s26, 1024  }
  0x38   : > { %688 = vsyncadd (%p773_p6), %s113_s26, 4294966272  ;;  %v712_v0 = vmov -inf   ;;  %v160_v1 = vld [vmem:[%s116_s30 + $0x18] sm:$0xff]  ;;  %v161_v2 = vld [vmem:[%s116_s30 + $0x20] sm:$0xff]  ;;  %s713_s17 = smov 16   ;;  %s714_s25 = smov 112  }
  0x39   : > { %144 = vst [vmem:[#allocation2 + $0x40] sm:$0x1] %v712_v0  ;;  %145 = vst [vmem:[#allocation2 + $0x50] sm:$0x1] %v712_v0  ;;  %v162_v3 = vld [vmem:[%s116_s30 + $0x28] sm:$0xff]  ;;  %v157_v4 = vld [vmem:[%s116_s30] sm:$0xff] }
  0x3a   : > { %146 = vst [vmem:[#allocation2 + $0x60] sm:$0x1] %v712_v0  ;;  %135 = vst [vmem:[#allocation2] sm:$0xff] %v712_v0  ;;  %v158_v5 = vld [vmem:[%s116_s30 + $0x8] sm:$0xff]  ;;  %v163_v6 = vld [vmem:[%s116_s30 + $0x30] sm:$0xff]  ;;  %vm268_vm0 = vcmask 130048  }
  0x3b   : > { %136 = vst [vmem:[#allocation2 + $0x8] sm:$0x3] %v712_v0  ;;  %141 = vst [vmem:[#allocation2 + $0x10] sm:$0x1] %v712_v0  ;;  %v164_v7 = vld [vmem:[%s116_s30 + $0x38] sm:$0xff]  ;;  %v159_v8 = vld [vmem:[%s116_s30 + $0x10] sm:$0xff] }
  0x3c   : > { %142 = vst [vmem:[#allocation2 + $0x20] sm:$0x1] %v712_v0  ;;  %143 = vst [vmem:[#allocation2 + $0x30] sm:$0x1] %v712_v0  ;;  %vm289_vm1 = vcmask 916480   ;;  %vm358_vm2 = vcmask 521216  }
  0x3d   : > { %147 = vst [vmem:[#allocation2 + $0x70] sm:$0x1] %v712_v0  ;;  %148 = vst [vmem:[#allocation2 + $0x80] sm:$0x1] %v712_v0  ;;  %vm362_vm3 = vcmask 516096   ;;  %s715_s27 = smov 96  }
  0x3e   : > { %168 = vst [vmem:[#allocation2 + $0x41] sm:$0xff] %v160_v1  ;;  %169 = vst [vmem:[#allocation2 + $0x51] sm:$0xff] %v161_v2  ;;  %s716_s28 = smov 80   ;;  %vm342_vm4 = vcmask 261120   ;;  %vm347_vm5 = vcmask 392192   ;;  %vm353_vm6 = vcmask 519168  }
  0x3f   : > { %170 = vst [vmem:[#allocation2 + $0x61] sm:$0xff] %v162_v3  ;;  %165 = vst [vmem:[#allocation2 + $0x11] sm:$0xff] %v157_v4  ;;  %s548_s29 = sshll.u32 %s834_s23, 2  ;;  %vm450_vm7 = vcmask 254976   ;;  %s555_s4 = sshll.u32 %s751_s10, 6 }
  0x40   : > { %166 = vst [vmem:[#allocation2 + $0x21] sm:$0xff] %v158_v5  ;;  %171 = vst [vmem:[#allocation2 + $0x71] sm:$0xff] %v163_v6  ;;  %s134_s2 = scalar_lea.vmem [#allocation7], %s548_s29  ;;  %s912_s13 = scalar_lea.hbm %s957_s1, %s555_s4 }
  0x41   : > { %172 = vst [vmem:[#allocation2 + $0x81] sm:$0xff] %v164_v7  ;;  %167 = vst [vmem:[#allocation2 + $0x31] sm:$0xff] %v159_v8  ;;  %v173_v9 = vld [vmem:[#allocation2] ss:$2 sm:$0xf]  ;;  %s467_s3 = sshll.u32 %s134_s2, 4  ;;  %s906_s3 = int_to_ptr.vmem [resolvable:$true] %s467_s3 }
  0x42   : > { %v191_v10 = vld [vmem:[#allocation2 + $0x1] ss:$2 sm:$0xf]  ;;  %v218_v15 = vld [vmem:[#allocation2 + $0x2] ss:$2 sm:$0xf] }
  0x43   : > { %v208_v19 = vmax.f32 %v173_v9, %v191_v10  ;;  %359 = vst.msk [vmem:[#allocation3] sm:$0x3f] %vm358_vm2, %v712_v0  ;;  %s454_s14 = scalar_lea.sflag [#allocation6], %s834_s23  ;;  %s641_s16 = scalar_lea.vmem %s906_s3, 64 }
  0x44   : > { %363 = vst.msk [vmem:[#allocation3 + $0x8] sm:$0x1] %vm362_vm3, %v712_v0  ;;  %364 = vst.msk [vmem:[#allocation3 + $0x10] sm:$0x1] %vm362_vm3, %v712_v0  ;;  %p642_p6 = scmp.ne.s32.totalorder %s906_s3, %s641_s16  ;;  %p964_p11 = scmp.ne.s32.totalorder %s961_s18, 0 }
  0x45   : > { %v181_v11 = vld [vmem:[#allocation2 + $0x40] ss:$2 sm:$0xf]  ;;  %v183_v12 = vld [vmem:[#allocation2 + $0x50] ss:$2 sm:$0xf]  ;;  %v235_v34 = vmax.f32 %v208_v19, %v218_v15 }
  0x46   : > { %v185_v13 = vld [vmem:[#allocation2 + $0x60] ss:$2 sm:$0xf]  ;;  %v199_v14 = vld [vmem:[#allocation2 + $0x41] ss:$2 sm:$0xf]  ;;  %p643_p12 = pnand %p642_p6, %p964_p11 }
  0x47   : > { %v201_v16 = vld [vmem:[#allocation2 + $0x51] ss:$2 sm:$0xf]  ;;  %v203_v17 = vld [vmem:[#allocation2 + $0x61] ss:$2 sm:$0xf]  ;;  %v212_v18 = vmax.f32 %v181_v11, %v199_v14 }
  0x48   : > { %v213_v20 = vmax.f32 %v183_v12, %v201_v16  ;;  %v214_v21 = vmax.f32 %v185_v13, %v203_v17  ;;  %v226_v22 = vld [vmem:[#allocation2 + $0x42] ss:$2 sm:$0xf]  ;;  %v228_v23 = vld [vmem:[#allocation2 + $0x52] ss:$2 sm:$0xf]  ;;  %p644_p13 = pneg %p643_p12 }
  0x49   : > { %v230_v24 = vld [vmem:[#allocation2 + $0x62] ss:$2 sm:$0xf]  ;;  %v239_v25 = vmax.f32 %v212_v18, %v226_v22  ;;  %v175_v26 = vld [vmem:[#allocation2 + $0x10] ss:$2 sm:$0xf] }
  0x4a   : > { %v240_v27 = vmax.f32 %v213_v20, %v228_v23  ;;  %v241_v28 = vmax.f32 %v214_v21, %v230_v24  ;;  %v177_v29 = vld [vmem:[#allocation2 + $0x20] ss:$2 sm:$0xf]  ;;  %v193_v30 = vld [vmem:[#allocation2 + $0x11] ss:$2 sm:$0xf] }
  0x4b   : > { %v195_v31 = vld [vmem:[#allocation2 + $0x21] ss:$2 sm:$0xf]  ;;  %v209_v32 = vmax.f32 %v175_v26, %v193_v30  ;;  %v220_v33 = vld [vmem:[#allocation2 + $0x12] ss:$2 sm:$0xf] }
  0x4c   : > { %v248_v35 = vmax.f32 %v239_v25, %v240_v27  ;;  %v210_v36 = vmax.f32 %v177_v29, %v195_v31  ;;  %v222_v37 = vld [vmem:[#allocation2 + $0x22] ss:$2 sm:$0xf]  ;;  %v187_v38 = vld [vmem:[#allocation2 + $0x70] ss:$2 sm:$0xf] }
  0x4d   : > { %v236_v39 = vmax.f32 %v209_v32, %v220_v33  ;;  %v189_v40 = vld [vmem:[#allocation2 + $0x80] ss:$2 sm:$0xf]  ;;  %v205_v41 = vld [vmem:[#allocation2 + $0x71] ss:$2 sm:$0xf] }
  0x4e   : > { %v249_v42 = vmax.f32 %v248_v35, %v241_v28  ;;  %v237_v43 = vmax.f32 %v210_v36, %v222_v37  ;;  %v207_v44 = vld [vmem:[#allocation2 + $0x81] ss:$2 sm:$0xf]  ;;  %v215_v45 = vmax.f32 %v187_v38, %v205_v41  ;;  %v232_v46 = vld [vmem:[#allocation2 + $0x72] ss:$2 sm:$0xf] }
  0x4f   : > { %v244_v47 = vmax.f32 %v235_v34, %v236_v39  ;;  %v216_v48 = vmax.f32 %v189_v40, %v207_v44  ;;  %v234_v49 = vld [vmem:[#allocation2 + $0x82] ss:$2 sm:$0xf]  ;;  %v179_v50 = vld [vmem:[#allocation2 + $0x30] ss:$2 sm:$0xf] }
  0x50   : > { %260 = vrot.lane.b32.xlu1 %v249_v42, %s713_s17  ;;  %v242_v51 = vmax.f32 %v215_v45, %v232_v46  ;;  %v197_v52 = vld [vmem:[#allocation2 + $0x31] ss:$2 sm:$0xf]  ;;  %v224_v53 = vld [vmem:[#allocation2 + $0x32] ss:$2 sm:$0xf] }
  0x51   : > { %v245_v54 = vmax.f32 %v244_v47, %v237_v43  ;;  %v243_v55 = vmax.f32 %v216_v48, %v234_v49  ;;  %v211_v56 = vmax.f32 %v179_v50, %v197_v52  ;;  %365 = vst.msk [vmem:[#allocation3 + $0x18] sm:$0x1] %vm362_vm3, %v712_v0  ;;  %366 = vst.msk [vmem:[#allocation3 + $0x20] sm:$0x1] %vm362_vm3, %v712_v0  ;;  %s717_s10 = smov [#allocation7]  }
  0x52   : > { %v250_v57 = vmax.f32 %v241_v28, %v242_v51  ;;  %v371_v41 = vld [vmem:[#allocation3] ss:$2 sm:$0x3]  ;;  %s645_s20 = sshll.u32 %s717_s10, 4  ;;  %s646_s20 = int_to_ptr.vmem [resolvable:$false] %s645_s20 }
  0x53   : > { %256 = vrot.lane.b32.xlu0 %v245_v54, %s713_s17  ;;  %v238_v58 = vmax.f32 %v211_v56, %v224_v53  ;;  %v396_v51 = vld [vmem:[#allocation3 + $0x2] ss:$2 sm:$0x3]  ;;  %s647_s21 = scalar_lea.vmem %s646_s20, 128  ;;  %p648_p8 = scmp.lt.s32.totalorder %s906_s3, %s646_s20 }
  0x54   : > { %v251_v59 = vmax.f32 %v250_v57, %v243_v55  ;;  %p649_p10 = scmp.lt.s32.totalorder %s647_s21, %s641_s16 }
  0x55   : > { %v246_v60 = vmax.f32 %v237_v43, %v238_v58 }
  0x56   : > { %262 = vrot.lane.b32.xlu1 %v251_v59, %s713_s17  ;;  %p650_p0 = por %p649_p10, %p648_p8 }
  0x57   : > { %v247_v61 = vmax.f32 %v246_v60, %v239_v25 }
  0x58   : > { %p651_p2 = pnand %p650_p0, %p644_p13 }
  0x59   : > { %258 = vrot.lane.b32.xlu0 %v247_v61, %s713_s17 }
  0x5a   : > { %279 = vrot.lane.b32.xlu1 %v247_v61, %s714_s25 }
  0x5d   : > { %277 = vrot.lane.b32.xlu0 %v245_v54, %s714_s25 }
  0x5e   : > { %283 = vrot.lane.b32.xlu1 %v251_v59, %s714_s25 }
  0x61   : > { %281 = vrot.lane.b32.xlu0 %v249_v42, %s714_s25 }
  0xc2   : > { %v261_v62 = vpop.permute.xlu1 %260 }
  0xc3   : > { %v271_v11 = vsel %vm268_vm0, -inf, %v261_v62 }
  0xc4   : > { %v275_v14 = vmax.f32 %v271_v11, %v249_v42  ;;  %v381_v42 = vld [vmem:[#allocation3 + $0x1] ss:$2 sm:$0x3] }
  0xc5   : > { %v257_v63 = vpop.permute.xlu0 %256  ;;  %v390_v48 = vmax.f32 %v371_v41, %v381_v42 }
  0xc6   : > { %v269_v3 = vsel %vm268_vm0, -inf, %v257_v63 }
  0xc7   : > { %v273_v8 = vmax.f32 %v269_v3, %v245_v54  ;;  %v405_v56 = vmax.f32 %v390_v48, %v396_v51 }
  0xc8   : > { %v263_v1 = vpop.permute.xlu1 %262 }
  0xc9   : > { %v272_v19 = vsel %vm268_vm0, -inf, %v263_v1 }
  0xca   : > { %v276_v21 = vmax.f32 %v272_v19, %v251_v59 }
  0xcb   : > { %v259_v2 = vpop.permute.xlu0 %258 }
  0xcc   : > { %v270_v4 = vsel %vm268_vm0, -inf, %v259_v2  ;;  %v280_v5 = vpop.permute.xlu1 %279 }
  0xcd   : > { %v274_v6 = vmax.f32 %v270_v4, %v247_v61  ;;  %v291_v7 = vsel %vm289_vm1, %v280_v5, -inf }
  0xcf   : > { %v295_v9 = vmax.f32 %v274_v6, %v291_v7  ;;  %v278_v10 = vpop.permute.xlu0 %277 }
  0xd0   : > { %v290_v12 = vsel %vm289_vm1, %v278_v10, -inf  ;;  %v284_v18 = vpop.permute.xlu1 %283 }
  0xd1   : > { %v294_v13 = vmax.f32 %v273_v8, %v290_v12  ;;  %304 = vrot.lane.b32.xlu1 %v295_v9, %s714_s25  ;;  %v293_v20 = vsel %vm289_vm1, %v284_v18, -inf }
  0xd2   : > { %v297_v22 = vmax.f32 %v276_v21, %v293_v20 }
  0xd3   : > { %302 = vrot.lane.b32.xlu0 %v294_v13, %s714_s25  ;;  %v282_v15 = vpop.permute.xlu0 %281 }
  0xd4   : > { %v292_v16 = vsel %vm289_vm1, %v282_v15, -inf }
  0xd5   : > { %v296_v17 = vmax.f32 %v275_v14, %v292_v16  ;;  %314 = vrot.lane.b32.xlu1 %v294_v13, %s715_s27 }
  0xd7   : > { %306 = vrot.lane.b32.xlu0 %v296_v17, %s714_s25 }
  0xd9   : > { %318 = vrot.lane.b32.xlu1 %v296_v17, %s715_s27 }
  0xdb   : > { %316 = vrot.lane.b32.xlu0 %v295_v9, %s715_s27 }
  0xdd   : > { %326 = vrot.lane.b32.xlu1 %v294_v13, %s716_s28 }
  0xdf   : > { %308 = vrot.lane.b32.xlu0 %v297_v22, %s714_s25 }
  0xe1   : > { %330 = vrot.lane.b32.xlu1 %v296_v17, %s716_s28 }
  0xe3   : > { %328 = vrot.lane.b32.xlu0 %v295_v9, %s716_s28 }
  0xe5   : > { %332 = vrot.lane.b32.xlu1 %v297_v22, %s716_s28 }
  0xe7   : > { %320 = vrot.lane.b32.xlu0 %v297_v22, %s715_s27 }
 0x143   : > { %v305_v0 = vpop.permute.xlu1 %304 }
 0x144   : > { %v339_v36 = vsel %vm268_vm0, %v295_v9, %v305_v0 }
 0x145   : > { %v303_v23 = vpop.permute.xlu0 %302 }
 0x146   : > { %v338_v28 = vsel %vm268_vm0, %v294_v13, %v303_v23 }
 0x147   : > { %v315_v24 = vpop.permute.xlu1 %314 }
 0x148   : > { %v343_v29 = vsel %vm342_vm4, %v338_v28, %v315_v24 }
 0x149   : > { %v307_v25 = vpop.permute.xlu0 %306 }
 0x14a   : > { %v340_v33 = vsel %vm268_vm0, %v296_v17, %v307_v25 }
 0x14b   : > { %v319_v26 = vpop.permute.xlu1 %318 }
 0x14c   : > { %v345_v34 = vsel %vm342_vm4, %v340_v33, %v319_v26 }
 0x14d   : > { %v317_v27 = vpop.permute.xlu0 %316 }
 0x14e   : > { %v344_v38 = vsel %vm342_vm4, %v339_v36, %v317_v27 }
 0x14f   : > { %v327_v30 = vpop.permute.xlu1 %326 }
 0x150   : > { %v348_v31 = vsel %vm347_vm5, %v343_v29, %v327_v30 }
 0x151   : > { %354 = vst.msk [vmem:[#allocation3 + $0x9] sm:$0xf] %vm353_vm6, %v348_v31  ;;  %v309_v32 = vpop.permute.xlu0 %308 }
 0x152   : > { %v341_v46 = vsel %vm268_vm0, %v297_v22, %v309_v32 }
 0x153   : > { %v331_v35 = vpop.permute.xlu1 %330 }
 0x154   : > { %v350_v37 = vsel %vm347_vm5, %v345_v34, %v331_v35 }
 0x155   : > { %356 = vst.msk [vmem:[#allocation3 + $0x19] sm:$0xf] %vm353_vm6, %v350_v37  ;;  %v329_v39 = vpop.permute.xlu0 %328 }
 0x156   : > { %v349_v40 = vsel %vm347_vm5, %v344_v38, %v329_v39 }
 0x157   : > { %355 = vst.msk [vmem:[#allocation3 + $0x11] sm:$0xf] %vm353_vm6, %v349_v40  ;;  %v333_v43 = vpop.permute.xlu1 %332 }
 0x158   : > { %v373_v44 = vld [vmem:[#allocation3 + $0x8] ss:$2 sm:$0x3]  ;;  %v383_v45 = vld [vmem:[#allocation3 + $0x9] ss:$2 sm:$0x3] }
 0x159   : > { %v321_v47 = vpop.permute.xlu0 %320  ;;  %v391_v49 = vmax.f32 %v373_v44, %v383_v45  ;;  %v398_v53 = vld [vmem:[#allocation3 + $0xa] ss:$2 sm:$0x3] }
 0x15a   : > { %v346_v50 = vsel %vm342_vm4, %v341_v46, %v321_v47 }
 0x15b   : > { %v351_v52 = vsel %vm347_vm5, %v346_v50, %v333_v43  ;;  %v406_v57 = vmax.f32 %v391_v49, %v398_v53 }
 0x15c   : > { %357 = vst.msk [vmem:[#allocation3 + $0x21] sm:$0xf] %vm353_vm6, %v351_v52  ;;  %v377_v54 = vld [vmem:[#allocation3 + $0x18] ss:$2 sm:$0x3] }
 0x15d   : > { %v387_v55 = vld [vmem:[#allocation3 + $0x19] ss:$2 sm:$0x3]  ;;  %v410_v1 = vmax.f32 %v405_v56, %v406_v57  ;;  %v402_v2 = vld [vmem:[#allocation3 + $0x1a] ss:$2 sm:$0x3] }
 0x15e   : > { %v375_v58 = vld [vmem:[#allocation3 + $0x10] ss:$2 sm:$0x3]  ;;  %v385_v59 = vld [vmem:[#allocation3 + $0x11] ss:$2 sm:$0x3]  ;;  %v393_v60 = vmax.f32 %v377_v54, %v387_v55 }
 0x15f   : > { %v392_v61 = vmax.f32 %v375_v58, %v385_v59  ;;  %v400_v62 = vld [vmem:[#allocation3 + $0x12] ss:$2 sm:$0x3] }
 0x160   : > { %v408_v3 = vmax.f32 %v393_v60, %v402_v2 }
 0x161   : > { %v407_v63 = vmax.f32 %v392_v61, %v400_v62 }
 0x163   : > { %v411_v4 = vmax.f32 %v410_v1, %v407_v63  ;;  %v379_v5 = vld [vmem:[#allocation3 + $0x20] ss:$2 sm:$0x3]  ;;  %v389_v6 = vld [vmem:[#allocation3 + $0x21] ss:$2 sm:$0x3]  ;;  %v412_v10 = vmax.f32 %v407_v63, %v408_v3 }
 0x164   : > { %v394_v7 = vmax.f32 %v379_v5, %v389_v6  ;;  %v404_v8 = vld [vmem:[#allocation3 + $0x22] ss:$2 sm:$0x3] }
 0x165   : > { %416 = vrot.lane.b32.xlu0 %v411_v4, %s713_s17 }
 0x166   : > { %v409_v9 = vmax.f32 %v394_v7, %v404_v8 }
 0x168   : > { %v413_v11 = vmax.f32 %v412_v10, %v409_v9 }
 0x169   : > { %426 = vrot.lane.b32.xlu0 %v411_v4, %s714_s25 }
 0x16a   : > { %418 = vrot.lane.b32.xlu1 %v413_v11, %s713_s17 }
 0x16e   : > { %428 = vrot.lane.b32.xlu1 %v413_v11, %s714_s25 }
 0x1d7   : > { %v417_v12 = vpop.permute.xlu0 %416 }
 0x1d8   : > { %v422_v13 = vsel %vm268_vm0, -inf, %v417_v12 }
 0x1d9   : > { %v424_v14 = vmax.f32 %v422_v13, %v411_v4 }
 0x1db   : > { %v427_v15 = vpop.permute.xlu0 %426 }
 0x1dc   : > { %v432_v16 = vsel %vm347_vm5, %v427_v15, -inf  ;;  %v419_v17 = vpop.permute.xlu1 %418 }
 0x1dd   : > { %v434_v18 = vmax.f32 %v424_v14, %v432_v16  ;;  %v423_v19 = vsel %vm268_vm0, -inf, %v419_v17 }
 0x1de   : > { %v425_v20 = vmax.f32 %v423_v19, %v413_v11 }
 0x1df   : > { %438 = vrot.lane.b32.xlu0 %v434_v18, %s714_s25 }
 0x1e0   : > { %v429_v21 = vpop.permute.xlu1 %428 }
 0x1e1   : > { %v433_v22 = vsel %vm347_vm5, %v429_v21, -inf }
 0x1e2   : > { %v435_v0 = vmax.f32 %v425_v20, %v433_v22 }
 0x1e4   : > { %440 = vrot.lane.b32.xlu1 %v435_v0, %s714_s25 }
 0x251   : > { %v439_v23 = vpop.permute.xlu0 %438 }
 0x252   : > { %v444_v24 = vsel %vm268_vm0, %v434_v18, %v439_v23 }
 0x253   : > { %vm446_vm8 = vcmp.eq.f32.partialorder %v444_v24, -inf }
 0x254   : > { %v448_v25 = vsel %vm446_vm8, 0.0, %v444_v24 }
 0x255   : > { %451 = vst.msk [vmem:[%s134_s2] sm:$0x3] %vm450_vm7, %v448_v25 }
 0x256   : > { %v441_v26 = vpop.permute.xlu1 %440 }
 0x257   : > { %v445_v27 = vsel %vm268_vm0, %v435_v0, %v441_v26 }
 0x258   : > { %vm447_vm9 = vcmp.eq.f32.partialorder %v445_v27, -inf }
 0x259   : > { %v449_v28 = vsel %vm447_vm9, 0.0, %v445_v27 }
 0x25a   : > { %452 = vst.msk [vmem:[%s134_s2 + $0x2] sm:$0x3] %vm450_vm7, %v449_v28 }
 0x25b   : > { %654 = shalt.err (!%p651_p2)
}
 0x25c   : > { %s655_s22 = scalar_lea.hbm %s912_s13, 64  ;;  %s659_s30 = scalar_lea.hbm %s957_s1, 128 }
 0x25d   : > { %p656_p4 = scmp.ne.s32.totalorder %s912_s13, %s655_s22  ;;  %p660_p9 = scmp.lt.u32.totalorder %s912_s13, %s957_s1 }
 0x25e   : > { %p661_p1 = scmp.lt.u32.totalorder %s659_s30, %s655_s22  ;;  %p663_p6 = scmp.lt.u32.totalorder %s655_s22, %s912_s13 }
 0x25f   : > { %p657_p5 = pnand %p656_p4, %p964_p11 }
 0x260   : > { %p662_p3 = por %p661_p1, %p660_p9 }
 0x261   : > { %p658_p7 = pneg %p657_p5 }
 0x262   : > { %p664_p12 = por %p663_p6, %p662_p3 }
 0x264   : > { %p665_p13 = pnand %p664_p12, %p658_p7 }
 0x266   : > { %668 = shalt.err (!%p665_p13)
}
 0x267   : > { %s718_s27 = smov 32   ;;  %s719_s28 = smov 2  }
 0x268   : > { %558 = dma.vmem_to_hbm [thread:$0]  (%p964_p11), %s906_s3, 64, %s912_s13, %s454_s14, %s718_s27, %s718_s27, %s719_s28  }
 0x269 PF: > { %s482_s29 = sand.u32 1, %s695_s6   ;;  %p965_p8 = scmp.ne.s32.totalorder %s962_s19, 0 }
 0x26a   : > { %p966_p10 = scmp.ge.s32.totalorder %s707_s9, 2  ;;  %s483_s2 = scalar_lea.sflag [#allocation6], %s482_s29 }
 0x26c   : > { %p565_p0 = pnand %p966_p10, %p965_p8 }
 0x26e   : > { %690 = dma.done.wait (!%p565_p0), %s483_s2, 64  }
 0x26f   : > { %692 = vsyncadd (!%p565_p0), %s483_s2, 4294967232  ;;  %p14_p2 = scmp.ge.s32.totalorder %s755_s12, 4   ;;  %s967_s6 = smov %s699_s7 }
 0x270   : > { %s968_s7 = smov %s703_s8  ;;  %s969_s8 = smov %s767_s15 }
 0x271   : > { %s970_s9 = smov %s755_s12  ;;  %16 = sbr.rel (!%p14_p2) target bundleno = 5 (0x5), region = 113 }
 0x278   :  { %488 = vsyncpa [#allocation5], 1 }
 0x279   :  { %490 = vsyncpa [#allocation5 + $0x1], 1 }
 0x27a   :  { %491 = vsyncpa [#allocation6], 1 }
 0x27b   :  { %493 = vsyncpa [#allocation6 + $0x1], 1 }

</bundles_post_ra>
